<compile_context>
chip_gen: v6e
topology: v6e:2x2x1
jax: 0.10.0
libtpu: 0.0.40
codegen_flags: <defaults>
</compile_context>

<pallas_src>
import functools

import jax
import jax.numpy as jnp
from jax.experimental import pallas as pl
from jax.experimental.pallas import tpu as pltpu


def _round_up(x, m):
    return ((x + m - 1) // m) * m


# -----------------------------------------------------------------------------
# Kernel: one (batch block, step) grid point.
#   x2   = modulus * [cos(phi) | sin(phi)]          (one packed 128-lane plane)
#   act  = relu(x2 @ Wcat[step] + eta_const + rho_const[step])
#   dot2 = act @ W2cat[step] + b2cat[step]          (eta duplicated + rho lane)
#   rho  = sigmoid(dot2[:, 2*Ls])
#   phi  = phi - rho * dot2                          (carried in VMEM scratch)
# -----------------------------------------------------------------------------
def _srel_kernel(phi_ref, wcat_ref, w2cat_ref, b2cat_ref, etac_ref, rhoc_ref,
                 s_out_ref, eta_out_ref, sfin_ref, phi_scr,
                 *, modulus, ls, rho_lane):
    j = pl.program_id(1)

    @pl.when(j == 0)
    def _():
        phi_scr[...] = phi_ref[...]

    phi = phi_scr[...]                                          # (TB, P)
    lane = jax.lax.broadcasted_iota(jnp.int32, phi.shape, 1)
    is_real = lane < ls

    # s = modulus * exp(i*phi): real on lanes [0:Ls], imag on lanes [Ls:2Ls]
    x2 = modulus * jnp.where(is_real, jnp.cos(phi), jnp.sin(phi))
    s_out_ref[0] = x2                                           # full lane-dense store

    # fused first layer (eta hidden | rho hidden packed on lanes)
    pre = (jnp.dot(x2, wcat_ref[0], preferred_element_type=jnp.float32)
           + etac_ref[...] + rhoc_ref[0])
    act = jnp.maximum(pre, 0.0)                                 # (TB, Hc)

    # fused second layer: eta duplicated on both halves + rho pre-act on lane 2*Ls
    dot2 = (jnp.dot(act, w2cat_ref[0], preferred_element_type=jnp.float32)
            + b2cat_ref[0])
    eta_out_ref[0] = dot2                                       # wrapper slices [:Ls]

    rho = jax.nn.sigmoid(dot2[:, rho_lane:rho_lane + 1])        # (TB, 1)
    phi_new = phi - rho * dot2                                  # dup eta updates both halves
    phi_scr[...] = phi_new

    @pl.when(j == pl.num_programs(1) - 1)
    def _():
        sfin_ref[...] = modulus * jnp.where(is_real, jnp.cos(phi_new), jnp.sin(phi_new))


def srel_rep_etaL_forward(phi, w_real, w_imag, y, params, *, modulus, n_step,
                          block_b=256):
    """Pallas-backed forward. Returns dict mirroring the PyTorch module."""
    B, Ls = phi.shape
    Ly = y.shape[0]
    H = params["b1"].shape[0]
    S = n_step

    LANE = 128
    P = _round_up(2 * Ls + 1, LANE)        # packed s / eta plane; rho lane = 2*Ls
    Hc = _round_up(2 * H, LANE)            # packed hidden plane: eta [0:H], rho [H:2H]
    rho_lane = 2 * Ls

    # batch tiling: multiple of 8 sublanes, >= 2 blocks when possible (v7x megacore)
    B8 = _round_up(B, 8)
    TB = min(_round_up(block_b, 8), B8)
    if B8 // TB < 2 and B8 >= 16:
        TB = max(8, _round_up(B8 // 2, 8))
    B_pad = _round_up(B, TB)
    n_blocks = B_pad // TB

    W1 = params["W1"].astype(jnp.float32)
    b1 = params["b1"].astype(jnp.float32)
    W2 = params["W2"].astype(jnp.float32)
    b2 = params["b2"].astype(jnp.float32)
    Wr1 = params["Wr1_all"].astype(jnp.float32)
    br1 = params["br1_all"].astype(jnp.float32)
    wr2 = params["wr2_all"].astype(jnp.float32)
    br2 = params["br2_all"].astype(jnp.float32)

    # ---- fold loop-invariant inputs (w_real, w_imag, y) into first-layer consts ----
    y_b = jnp.broadcast_to(y.astype(jnp.float32)[None, :], (B, Ly))
    x_const = jnp.concatenate([w_real.astype(jnp.float32),
                               w_imag.astype(jnp.float32), y_b], axis=1)
    h_eta_const = x_const @ W1[2 * Ls:] + b1[None, :]                    # (B, H)
    hr_const = (jnp.einsum("bd,sdh->sbh", x_const, Wr1[:, 2 * Ls:, :])
                + br1[:, None, :])                                       # (S, B, H)

    # ---- packed fused first-layer weights (S, P, Hc) ----
    wcat = jnp.zeros((S, P, Hc), jnp.float32)
    wcat = wcat.at[:, :Ls, :H].set(jnp.broadcast_to(W1[None, :Ls], (S, Ls, H)))
    wcat = wcat.at[:, Ls:2 * Ls, :H].set(jnp.broadcast_to(W1[None, Ls:2 * Ls], (S, Ls, H)))
    wcat = wcat.at[:, :Ls, H:2 * H].set(Wr1[:, :Ls, :])
    wcat = wcat.at[:, Ls:2 * Ls, H:2 * H].set(Wr1[:, Ls:2 * Ls, :])

    # ---- packed fused second-layer weights (S, Hc, P): duplicated eta + rho lane ----
    w2cat = jnp.zeros((S, Hc, P), jnp.float32)
    w2cat = w2cat.at[:, :H, :Ls].set(jnp.broadcast_to(W2[None], (S, H, Ls)))
    w2cat = w2cat.at[:, :H, Ls:2 * Ls].set(jnp.broadcast_to(W2[None], (S, H, Ls)))
    w2cat = w2cat.at[:, H:2 * H, rho_lane].set(wr2)
    b2cat = jnp.zeros((S, 1, P), jnp.float32)
    b2cat = b2cat.at[:, 0, :Ls].set(jnp.broadcast_to(b2[None], (S, Ls)))
    b2cat = b2cat.at[:, 0, Ls:2 * Ls].set(jnp.broadcast_to(b2[None], (S, Ls)))
    b2cat = b2cat.at[:, 0, rho_lane].set(br2)

    # ---- first-layer constants: step-invariant eta part split from per-step rho ----
    eta_const = jnp.zeros((B_pad, Hc), jnp.float32).at[:B, :H].set(h_eta_const)
    rho_const = jnp.zeros((S, B_pad, Hc), jnp.float32).at[:, :B, H:2 * H].set(hr_const)

    # ---- packed phi: [phi | phi | 0] so one plane drives both cos and sin lanes ----
    phi2 = jnp.zeros((B_pad, P), jnp.float32)
    phi2 = phi2.at[:B, :Ls].set(phi.astype(jnp.float32))
    phi2 = phi2.at[:B, Ls:2 * Ls].set(phi.astype(jnp.float32))

    # ---- VMEM budget (double-buffered streamed blocks + resident blocks + scratch) ----
    f32b = 4
    est = f32b * (
        2 * TB * P                        # phi2 block
        + 2 * P * Hc + 2 * Hc * P         # wcat / w2cat step blocks
        + 2 * 8 * P                       # b2cat (sublane-padded)
        + 2 * TB * Hc + 2 * TB * Hc       # eta_const / rho_const blocks
        + 2 * TB * P + 2 * TB * P         # s / eta output blocks
        + 2 * TB * P                      # final-s output block
        + TB * P                          # phi carry scratch
    )
    try:
        vmem_cap = int(pltpu.get_tpu_info().vmem_capacity_bytes)
    except Exception:
        vmem_cap = 64 << 20               # assume smallest per-core VMEM (v7x)
    vmem_limit = int(min(max(2 * est, 16 << 20), (3 * vmem_cap) // 4))

    kernel = functools.partial(_srel_kernel, modulus=float(modulus),
                               ls=Ls, rho_lane=rho_lane)

    in_specs = [
        pl.BlockSpec((TB, P), lambda i, j: (i, 0)),            # phi2 (resident over j)
        pl.BlockSpec((1, P, Hc), lambda i, j: (j, 0, 0)),      # Wcat[step]
        pl.BlockSpec((1, Hc, P), lambda i, j: (j, 0, 0)),      # W2cat[step]
        pl.BlockSpec((1, 1, P), lambda i, j: (j, 0, 0)),       # b2cat[step]
        pl.BlockSpec((TB, Hc), lambda i, j: (i, 0)),           # eta const (resident over j)
        pl.BlockSpec((1, TB, Hc), lambda i, j: (j, i, 0)),     # rho const[step]
    ]
    out_specs = (
        pl.BlockSpec((1, TB, P), lambda i, j: (j, i, 0)),      # s (step-major)
        pl.BlockSpec((1, TB, P), lambda i, j: (j, i, 0)),      # eta (step-major)
        pl.BlockSpec((TB, P), lambda i, j: (i, 0)),            # final s
    )
    out_shapes = (
        jax.ShapeDtypeStruct((S, B_pad, P), jnp.float32),
        jax.ShapeDtypeStruct((S, B_pad, P), jnp.float32),
        jax.ShapeDtypeStruct((B_pad, P), jnp.float32),
    )

    s_out, eta_out, s_fin = pl.pallas_call(
        kernel,
        grid=(n_blocks, n_step),
        in_specs=in_specs,
        out_specs=out_specs,
        out_shape=out_shapes,
        scratch_shapes=[pltpu.VMEM((TB, P), jnp.float32)],
        compiler_params=pltpu.CompilerParams(
            dimension_semantics=("parallel", "arbitrary"),
            vmem_limit_bytes=vmem_limit),
    )(phi2, wcat, w2cat, b2cat, eta_const, rho_const)

    # ---- unpack / layout plumbing (wrapper-side, not compute) ----
    s_steps_r = jnp.transpose(s_out[:, :B, :Ls], (1, 0, 2))               # (B, S, Ls)
    s_steps_i = jnp.transpose(s_out[:, :B, Ls:2 * Ls], (1, 0, 2))
    s_r = jnp.concatenate([s_steps_r, s_fin[:B, None, :Ls]], axis=1)      # (B, S+1, Ls)
    s_i = jnp.concatenate([s_steps_i, s_fin[:B, None, Ls:2 * Ls]], axis=1)
    s_stack = (s_r + 1j * s_i).astype(jnp.complex64)
    eta_stack = jnp.transpose(eta_out[:, :B, :Ls], (1, 0, 2))             # (B, S, Ls)
    return {"s_stack_batch": s_stack, "eta_stack_batch": eta_stack}


# -----------------------------------------------------------------------------
# Pure-JAX reference (mirrors the PyTorch forward 1:1) for correctness check.
# -----------------------------------------------------------------------------
def srel_reference(phi, w_real, w_imag, y, params, *, modulus, n_step):
    B, Ls = phi.shape
    y_b = jnp.broadcast_to(y[None, :], (B, y.shape[0]))
    W1, b1, W2, b2 = params["W1"], params["b1"], params["W2"], params["b2"]
    Wr1, br1 = params["Wr1_all"], params["br1_all"]
    wr2, br2 = params["wr2_all"], params["br2_all"]

    s_stack, eta_stack = [], []
    for step in range(n_step):
        s_r = modulus * jnp.cos(phi)
        s_i = modulus * jnp.sin(phi)
        s_stack.append(s_r + 1j * s_i)
        x = jnp.concatenate([s_r, s_i, w_real, w_imag, y_b], axis=1)
        h = jax.nn.relu(x @ W1 + b1)
        eta = h @ W2 + b2
        hr = jax.nn.relu(x @ Wr1[step] + br1[step])
        rho = jax.nn.sigmoid(hr @ wr2[step][:, None] + br2[step])
        eta_stack.append(eta)
        phi = phi - rho * eta
    s_stack.append(modulus * jnp.cos(phi) + 1j * modulus * jnp.sin(phi))
    return {
        "s_stack_batch": jnp.stack(s_stack, axis=1).astype(jnp.complex64),
        "eta_stack_batch": jnp.stack(eta_stack, axis=1),
    }


if __name__ == "__main__":
    # constants (small, consistent with the module): Ls = Nt*N
    Nt, N = 2, 4
    Ls = Nt * N          # 8
    Lw = 4
    Ly = 8
    N_step = 3
    modulus = 1.0
    H = 32               # hidden width of the MLPs
    B = 16               # small batch -> 2 batch blocks of 8 rows
    D = 2 * Ls + 2 * Lw + Ly   # input feature dim of Estimate_etaL / rho nets

    key = jax.random.PRNGKey(0)
    ks = jax.random.split(key, 12)

    params = {
        "W1": jax.random.normal(ks[0], (D, H), jnp.float32) / jnp.sqrt(D),
        "b1": jax.random.normal(ks[1], (H,), jnp.float32) * 0.01,
        "W2": jax.random.normal(ks[2], (H, Ls), jnp.float32) / jnp.sqrt(H),
        "b2": jax.random.normal(ks[3], (Ls,), jnp.float32) * 0.01,
        "Wr1_all": jax.random.normal(ks[4], (N_step, D, H), jnp.float32) / jnp.sqrt(D),
        "br1_all": jax.random.normal(ks[5], (N_step, H), jnp.float32) * 0.01,
        "wr2_all": jax.random.normal(ks[6], (N_step, H), jnp.float32) / jnp.sqrt(H),
        "br2_all": jax.random.normal(ks[7], (N_step,), jnp.float32) * 0.01,
    }

    phi_batch = jax.random.uniform(ks[8], (B, Ls), jnp.float32,
                                   minval=-jnp.pi, maxval=jnp.pi)
    w_real = jax.random.normal(ks[9], (B, Lw), jnp.float32)
    w_imag = jax.random.normal(ks[10], (B, Lw), jnp.float32)
    y = jax.random.normal(ks[11], (Ly,), jnp.float32)

    out = srel_rep_etaL_forward(phi_batch, w_real, w_imag, y, params,
                                modulus=modulus, n_step=N_step)
    jax.block_until_ready(out)

    ref = srel_reference(phi_batch, w_real, w_imag, y, params,
                         modulus=modulus, n_step=N_step)

    assert out["s_stack_batch"].shape == (B, N_step + 1, Ls)
    assert out["s_stack_batch"].dtype == jnp.complex64
    assert out["eta_stack_batch"].shape == (B, N_step, Ls)
    assert jnp.allclose(out["eta_stack_batch"], ref["eta_stack_batch"],
                        atol=1e-3, rtol=1e-3)
    assert jnp.allclose(out["s_stack_batch"], ref["s_stack_batch"],
                        atol=1e-3, rtol=1e-3)

    print("KERNEL_OK")
</pallas_src>

<mosaic_0001>
module attributes {stable_mosaic.version = 11 : i64} {
  func.func @_srel_kernel(%arg0: i32, %arg1: i32, %arg2: memref<8x128xf32, #tpu.memory_space<vmem>>, %arg3: memref<1x128x128xf32, #tpu.memory_space<vmem>>, %arg4: memref<1x128x128xf32, #tpu.memory_space<vmem>>, %arg5: memref<1x1x128xf32, #tpu.memory_space<vmem>>, %arg6: memref<8x128xf32, #tpu.memory_space<vmem>>, %arg7: memref<1x8x128xf32, #tpu.memory_space<vmem>>, %arg8: memref<1x8x128xf32, #tpu.memory_space<vmem>>, %arg9: memref<1x8x128xf32, #tpu.memory_space<vmem>>, %arg10: memref<8x128xf32, #tpu.memory_space<vmem>>, %arg11: memref<8x128xf32, #tpu.memory_space<vmem>>) attributes {dimension_semantics = [#tpu.dimension_semantics<parallel>, #tpu.dimension_semantics<arbitrary>], iteration_bounds = array<i64: 2, 3>, scalar_prefetch = 0 : i64, scratch_operands = 1 : i64, tpu.core_type = #tpu.core_type<tc>, window_params = [{transform_indices = @transform_0, window_bounds = array<i64: 8, 128>}, {transform_indices = @transform_1, window_bounds = array<i64: 1, 128, 128>}, {transform_indices = @transform_2, window_bounds = array<i64: 1, 128, 128>}, {transform_indices = @transform_3, window_bounds = array<i64: 1, 1, 128>}, {transform_indices = @transform_4, window_bounds = array<i64: 8, 128>}, {transform_indices = @transform_5, window_bounds = array<i64: 1, 8, 128>}, {transform_indices = @transform_6, window_bounds = array<i64: 1, 8, 128>}, {transform_indices = @transform_7, window_bounds = array<i64: 1, 8, 128>}, {transform_indices = @transform_8, window_bounds = array<i64: 8, 128>}]} {
    %c0_i32 = arith.constant 0 : i32
    %0 = arith.cmpi eq, %arg1, %c0_i32 : i32
    %1 = arith.extui %0 : i1 to i32
    %c0_i32_0 = arith.constant 0 : i32
    %2 = arith.cmpi ne, %1, %c0_i32_0 : i32
    scf.if %2 {
      %c0_29 = arith.constant 0 : index
      %c0_30 = arith.constant 0 : index
      %48 = vector.load %arg2[%c0_29, %c0_30] : memref<8x128xf32, #tpu.memory_space<vmem>>, vector<8x128xf32>
      %c0_31 = arith.constant 0 : index
      %c0_32 = arith.constant 0 : index
      %49 = vector.load %arg11[%c0_31, %c0_32] : memref<8x128xf32, #tpu.memory_space<vmem>>, vector<8x128xf32>
      tpu.vector_store %arg11[%c0_31, %c0_32], %48 {strides = array<i32>} : memref<8x128xf32, #tpu.memory_space<vmem>>, vector<8x128xf32>,
    } else {
    }
    %c0 = arith.constant 0 : index
    %c0_1 = arith.constant 0 : index
    %3 = vector.load %arg11[%c0, %c0_1] : memref<8x128xf32, #tpu.memory_space<vmem>>, vector<8x128xf32>
    %4 = tpu.iota {dimensions = array<i32: 1>} : vector<8x128xi32>
    %c8_i32 = arith.constant 8 : i32
    %5 = vector.broadcast %c8_i32 : i32 to vector<8x128xi32>
    %6 = arith.cmpi slt, %4, %5 : vector<8x128xi32>
    %7 = math.cos %3 : vector<8x128xf32>
    %8 = math.sin %3 : vector<8x128xf32>
    %9 = arith.select %6, %7, %8 : vector<8x128xi1>, vector<8x128xf32>
    %cst = arith.constant 1.000000e+00 : f32
    %10 = vector.broadcast %cst : f32 to vector<8x128xf32>
    %11 = arith.mulf %10, %9 : vector<8x128xf32>
    %c0_2 = arith.constant 0 : index
    %c0_3 = arith.constant 0 : index
    %c0_4 = arith.constant 0 : index
    %12 = vector.load %arg8[%c0_2, %c0_3, %c0_4] : memref<1x8x128xf32, #tpu.memory_space<vmem>>, vector<1x8x128xf32>
    %13 = vector.shape_cast %12 : vector<1x8x128xf32> to vector<8x128xf32>
    %14 = vector.shape_cast %11 : vector<8x128xf32> to vector<1x8x128xf32>
    tpu.vector_store %arg8[%c0_2, %c0_3, %c0_4], %14 {strides = array<i32>} : memref<1x8x128xf32, #tpu.memory_space<vmem>>, vector<1x8x128xf32>,
    %c0_5 = arith.constant 0 : index
    %c0_6 = arith.constant 0 : index
    %c0_7 = arith.constant 0 : index
    %15 = vector.load %arg3[%c0_5, %c0_6, %c0_7] : memref<1x128x128xf32, #tpu.memory_space<vmem>>, vector<1x128x128xf32>
    %16 = vector.shape_cast %15 : vector<1x128x128xf32> to vector<128x128xf32>
    %cst_8 = arith.constant dense<0.000000e+00> : vector<8x128xf32>
    %17 = tpu.matmul %11, %16, %cst_8 {dimension_numbers = #tpu.dot_dimension_numbers<[1], [0], [0], [1], [0, 0, 1, 1], [], []>} : vector<8x128xf32>, vector<128x128xf32>, vector<8x128xf32> -> vector<8x128xf32>
    %c0_9 = arith.constant 0 : index
    %c0_10 = arith.constant 0 : index
    %18 = vector.load %arg6[%c0_9, %c0_10] : memref<8x128xf32, #tpu.memory_space<vmem>>, vector<8x128xf32>
    %19 = arith.addf %17, %18 : vector<8x128xf32>
    %c0_11 = arith.constant 0 : index
    %c0_12 = arith.constant 0 : index
    %c0_13 = arith.constant 0 : index
    %20 = vector.load %arg7[%c0_11, %c0_12, %c0_13] : memref<1x8x128xf32, #tpu.memory_space<vmem>>, vector<1x8x128xf32>
    %21 = vector.shape_cast %20 : vector<1x8x128xf32> to vector<8x128xf32>
    %22 = arith.addf %19, %21 : vector<8x128xf32>
    %cst_14 = arith.constant 0.000000e+00 : f32
    %23 = vector.broadcast %cst_14 : f32 to vector<8x128xf32>
    %24 = arith.maximumf %22, %23 : vector<8x128xf32>
    %c0_15 = arith.constant 0 : index
    %c0_16 = arith.constant 0 : index
    %c0_17 = arith.constant 0 : index
    %25 = vector.load %arg4[%c0_15, %c0_16, %c0_17] : memref<1x128x128xf32, #tpu.memory_space<vmem>>, vector<1x128x128xf32>
    %26 = vector.shape_cast %25 : vector<1x128x128xf32> to vector<128x128xf32>
    %cst_18 = arith.constant dense<0.000000e+00> : vector<8x128xf32>
    %27 = tpu.matmul %24, %26, %cst_18 {dimension_numbers = #tpu.dot_dimension_numbers<[1], [0], [0], [1], [0, 0, 1, 1], [], []>} : vector<8x128xf32>, vector<128x128xf32>, vector<8x128xf32> -> vector<8x128xf32>
    %c0_19 = arith.constant 0 : index
    %c0_20 = arith.constant 0 : index
    %c0_21 = arith.constant 0 : index
    %28 = vector.load %arg5[%c0_19, %c0_20, %c0_21] : memref<1x1x128xf32, #tpu.memory_space<vmem>>, vector<1x1x128xf32>
    %29 = vector.shape_cast %28 : vector<1x1x128xf32> to vector<1x128xf32>
    %30 = vector.broadcast %29 : vector<1x128xf32> to vector<8x128xf32>
    %31 = arith.addf %27, %30 : vector<8x128xf32>
    %c0_22 = arith.constant 0 : index
    %c0_23 = arith.constant 0 : index
    %c0_24 = arith.constant 0 : index
    %32 = vector.load %arg9[%c0_22, %c0_23, %c0_24] : memref<1x8x128xf32, #tpu.memory_space<vmem>>, vector<1x8x128xf32>
    %33 = vector.shape_cast %32 : vector<1x8x128xf32> to vector<8x128xf32>
    %34 = vector.shape_cast %31 : vector<8x128xf32> to vector<1x8x128xf32>
    tpu.vector_store %arg9[%c0_22, %c0_23, %c0_24], %34 {strides = array<i32>} : memref<1x8x128xf32, #tpu.memory_space<vmem>>, vector<1x8x128xf32>,
    %35 = vector.extract_strided_slice %31 {offsets = [0, 16], sizes = [8, 1], strides = [1, 1]} : vector<8x128xf32> to vector<8x1xf32>
    %36 = arith.negf %35 : vector<8x1xf32>
    %37 = math.exp %36 : vector<8x1xf32>
    %cst_25 = arith.constant 1.000000e+00 : f32
    %38 = vector.broadcast %cst_25 : f32 to vector<8x1xf32>
    %39 = arith.addf %38, %37 : vector<8x1xf32>
    %40 = arith.divf %38, %39 : vector<8x1xf32>
    %41 = vector.broadcast %40 : vector<8x1xf32> to vector<8x128xf32>
    %42 = arith.mulf %41, %31 : vector<8x128xf32>
    %43 = arith.subf %3, %42 : vector<8x128xf32>
    %c0_26 = arith.constant 0 : index
    %c0_27 = arith.constant 0 : index
    %44 = vector.load %arg11[%c0_26, %c0_27] : memref<8x128xf32, #tpu.memory_space<vmem>>, vector<8x128xf32>
    tpu.vector_store %arg11[%c0_26, %c0_27], %43 {strides = array<i32>} : memref<8x128xf32, #tpu.memory_space<vmem>>, vector<8x128xf32>,
    %c2_i32 = arith.constant 2 : i32
    %45 = arith.cmpi eq, %arg1, %c2_i32 : i32
    %46 = arith.extui %45 : i1 to i32
    %c0_i32_28 = arith.constant 0 : i32
    %47 = arith.cmpi ne, %46, %c0_i32_28 : i32
    scf.if %47 {
      %48 = math.cos %43 : vector<8x128xf32>
      %49 = math.sin %43 : vector<8x128xf32>
      %50 = arith.select %6, %48, %49 : vector<8x128xi1>, vector<8x128xf32>
      %cst_29 = arith.constant 1.000000e+00 : f32
      %51 = vector.broadcast %cst_29 : f32 to vector<8x128xf32>
      %52 = arith.mulf %51, %50 : vector<8x128xf32>
      %c0_30 = arith.constant 0 : index
      %c0_31 = arith.constant 0 : index
      %53 = vector.load %arg10[%c0_30, %c0_31] : memref<8x128xf32, #tpu.memory_space<vmem>>, vector<8x128xf32>
      tpu.vector_store %arg10[%c0_30, %c0_31], %52 {strides = array<i32>} : memref<8x128xf32, #tpu.memory_space<vmem>>, vector<8x128xf32>,
    } else {
    }
    return
  }
  func.func @transform_0(%arg0: i32, %arg1: i32) -> (i32, i32) {
    %c0_i32 = arith.constant 0 : i32
    %c0_i32_0 = arith.constant 0 : i32
    return %arg0, %c0_i32 : i32, i32
  }
  func.func @transform_1(%arg0: i32, %arg1: i32) -> (i32, i32, i32) {
    %c0_i32 = arith.constant 0 : i32
    %c0_i32_0 = arith.constant 0 : i32
    %c0_i32_1 = arith.constant 0 : i32
    return %arg1, %c0_i32, %c0_i32_0 : i32, i32, i32
  }
  func.func @transform_2(%arg0: i32, %arg1: i32) -> (i32, i32, i32) {
    %c0_i32 = arith.constant 0 : i32
    %c0_i32_0 = arith.constant 0 : i32
    %c0_i32_1 = arith.constant 0 : i32
    return %arg1, %c0_i32, %c0_i32_0 : i32, i32, i32
  }
  func.func @transform_3(%arg0: i32, %arg1: i32) -> (i32, i32, i32) {
    %c0_i32 = arith.constant 0 : i32
    %c0_i32_0 = arith.constant 0 : i32
    %c0_i32_1 = arith.constant 0 : i32
    return %arg1, %c0_i32, %c0_i32_0 : i32, i32, i32
  }
  func.func @transform_4(%arg0: i32, %arg1: i32) -> (i32, i32) {
    %c0_i32 = arith.constant 0 : i32
    %c0_i32_0 = arith.constant 0 : i32
    return %arg0, %c0_i32 : i32, i32
  }
  func.func @transform_5(%arg0: i32, %arg1: i32) -> (i32, i32, i32) {
    %c0_i32 = arith.constant 0 : i32
    %c0_i32_0 = arith.constant 0 : i32
    return %arg1, %arg0, %c0_i32 : i32, i32, i32
  }
  func.func @transform_6(%arg0: i32, %arg1: i32) -> (i32, i32, i32) {
    %c0_i32 = arith.constant 0 : i32
    %c0_i32_0 = arith.constant 0 : i32
    return %arg1, %arg0, %c0_i32 : i32, i32, i32
  }
  func.func @transform_7(%arg0: i32, %arg1: i32) -> (i32, i32, i32) {
    %c0_i32 = arith.constant 0 : i32
    %c0_i32_0 = arith.constant 0 : i32
    return %arg1, %arg0, %c0_i32 : i32, i32, i32
  }
  func.func @transform_8(%arg0: i32, %arg1: i32) -> (i32, i32) {
    %c0_i32 = arith.constant 0 : i32
    %c0_i32_0 = arith.constant 0 : i32
    return %arg0, %c0_i32 : i32, i32
  }
}

</mosaic_0001>

<bundles_post_ra>
// kernel: tpu_custom_call.1
= control target key start
LH: loop header
LB: loop body
LE: loop exit
PB: predicated region body
PF: predicated region fallthrough
CT: control target
= control target key end

     0   :  { %s2888_s0 = inlined_call_operand.hbm [shape: f32[16,128], index: 0, kind: input, shape index: {}]   ;;  %s2889_s1 = inlined_call_operand.hbm [shape: f32[3,128,128], index: 1, kind: input, shape index: {}]   ;;  %s2890_s2 = inlined_call_operand.hbm [shape: f32[3,128,128], index: 2, kind: input, shape index: {}]   ;;  %s2891_s3 = inlined_call_operand.vmem [shape: f32[3,1,128], index: 3, kind: input, shape index: {}]   ;;  %s2892_s4 = inlined_call_operand.hbm [shape: f32[16,128], index: 4, kind: input, shape index: {}]   ;;  %s2893_s5 = inlined_call_operand.hbm [shape: f32[3,16,128], index: 5, kind: input, shape index: {}]   ;;  %s2894_s6 = inlined_call_operand.hbm [shape: f32[3,16,128], index: 6, kind: output, shape index: {0}]   ;;  %s2895_s7 = inlined_call_operand.hbm [shape: f32[3,16,128], index: 7, kind: output, shape index: {1}]   ;;  %s2896_s8 = inlined_call_operand.hbm [shape: f32[16,128], index: 8, kind: output, shape index: {2}]  }
   0x1   :  { %2929 = sst [smem:[#allocation38_spill]] %s2888_s0 }
   0x2   :  { %2930 = sst [smem:[#allocation39_spill]] %s2889_s1 }
   0x3   :  { %2931 = sst [smem:[#allocation40_spill]] %s2890_s2 }
   0x4   :  { %2932 = sst [smem:[#allocation41_spill]] %s2891_s3 }
   0x5   :  { %2933 = sst [smem:[#allocation42_spill]] %s2892_s4 }
   0x6   :  { %2934 = sst [smem:[#allocation43_spill]] %s2893_s5 }
   0x7   :  { %2935 = sst [smem:[#allocation44_spill]] %s2894_s6 }
   0x8   :  { %2936 = sst [smem:[#allocation45_spill]] %s2895_s7 }
   0x9   :  { %2937 = sst [smem:[#allocation46_spill]] %s2896_s8 }
   0xa   :  { %14 = vsyncpa [#allocation4], 0 }
   0xb   :  { %16 = vsyncpa [#allocation4 + $0x1], 0 }
   0xc   :  { %17 = vsyncpa [#allocation7], 0 }
   0xd   :  { %19 = vsyncpa [#allocation7 + $0x1], 0 }
   0xe   :  { %20 = vsyncpa [#allocation10], 0 }
   0xf   :  { %22 = vsyncpa [#allocation10 + $0x1], 0 }
  0x10   :  { %23 = vsyncpa [#allocation5], 0 }
  0x11   :  { %25 = vsyncpa [#allocation5 + $0x1], 0 }
  0x12   :  { %26 = vsyncpa [#allocation14], 0 }
  0x13   :  { %28 = vsyncpa [#allocation14 + $0x1], 0  ;;  %s2232_s27 = smov 0   ;;  %s2234_s28 = smov 0  }
  0x14   :  { %s2236_s29 = smov 0   ;;  %s2238_s30 = smov 0  }
  0x15   :  { %s2240_s9 = smov 0   ;;  %s2242_s10 = smov 0  }
  0x16   :  { %s2244_s11 = smov 0   ;;  %s2246_s12 = smov 0  }
  0x17   :  { %s2248_s13 = smov 0   ;;  %s2250_s14 = smov 0  }
  0x18   :  { %s2252_s15 = smov 0   ;;  %s2254_s16 = smov 0  }
  0x19   :  { %s2256_s17 = smov 0   ;;  %s2258_s18 = smov 0  }
  0x1a LB: > { %2938 = sst [smem:[#allocation23_spill]] %s2124_s9  ;;  %s43_s19 = sadd.s32 1, %s2152_s16  ;;  %s2160_s18 = sphi %s2258_s18, %s34_s18   ;;  %s2156_s17 = sphi %s2256_s17, %s3023_s17   ;;  %s2152_s16 = sphi %s2254_s16, %s3022_s16   ;;  %s2148_s15 = sphi %s2252_s15, %s3021_s15   ;;  %s2144_s14 = sphi %s2250_s14, %s3020_s14   ;;  %s2140_s13 = sphi %s2248_s13, %s3013_s13   ;;  %s2136_s12 = sphi %s2246_s12, %s3012_s12   ;;  %s2132_s11 = sphi %s2244_s11, %s3011_s11   ;;  %s2128_s10 = sphi %s2242_s10, %s3010_s10   ;;  %s2124_s9 = sphi %s2240_s9, %s3009_s9   ;;  %s2120_s30 = sphi %s2238_s30, %s3008_s30   ;;  %s2116_s29 = sphi %s2236_s29, %s3019_s29   ;;  %s2112_s28 = sphi %s2234_s28, %s3018_s28   ;;  %s2108_s27 = sphi %s2232_s27, %s3017_s27  }
  0x1b   : > { %2939 = sst [smem:[#allocation24_spill]] %s2128_s10  ;;  %p2905_p0 = scmp.eq.s32.totalorder %s2160_s18, 0 }
  0x1c   : > { %2940 = sst [smem:[#allocation25_spill]] %s2136_s12  ;;  %p2304_p1 = scmp.ge.s32.totalorder %s43_s19, 3 }
  0x1d   : > { %2941 = sst [smem:[#allocation26_spill]] %s2140_s13  ;;  %s79_s21 = sadd.s32 1, %s2128_s10 }
  0x1e   : > { %2942 = sst [smem:[#allocation27_spill]] %s2144_s14  ;;  %p86_p2 = scmp.ne.s32.totalorder %s2128_s10, %s2124_s9 }
  0x1f   : > { %2943 = sst [smem:[#allocation28_spill]] %s2148_s15  ;;  %p92_p3 = scmp.ne.s32.totalorder %s2124_s9, %s2120_s30 }
  0x20   : > { %s3025_s19 = smov (%p2304_p1, %s43_s19), 0  ;;  %p88_p4 = por %p86_p2, %p2905_p0 }
  0x21   : > { %2945 = sst [smem:[#allocation29_spill]] %s3025_s19  ;;  %s2321_s22 = ssub.s32 %s2152_s16, %s3025_s19 }
  0x22   : > { %p2922_p5 = scmp.lt.s32.totalorder %s2160_s18, 6  ;;  %p77_p6 = scmp.eq.s32.totalorder %s2321_s22, 0 }
  0x23   : > { %s2903_s23 = sand.u32 1, %s2160_s18   ;;  %s324_s24 = sand.u32 1, %s2128_s10  }
  0x24   : > { %s2328_s25 = scalar_select %p77_p6, %s2128_s10, %s79_s21  }
  0x25   : > { %s2330_s26 = sshll.u32 %s324_s24, 7  ;;  %s1504_s8 = sshll.u32 %s2152_s16, 11 }
  0x26   : > { %2946 = sst [smem:[#allocation30_spill]] %s2328_s25  ;;  %s326_s3 = scalar_lea.vmem [#allocation6], %s2330_s26 }
  0x27   : > { %s2947_s1 = sld [smem:[#allocation39_spill]]  ;;  %s333_s14 = sshll.u32 %s326_s3, 4  ;;  %s334_s14 = int_to_ptr.vmem [resolvable:$true] %s333_s14 }
  0x28   : > { %p2339_p7 = pnand %p2922_p5, %p88_p4  ;;  %s2345_s21 = scalar_lea.sflag [#allocation7], %s2903_s23 }
  0x29   : > { %s1817_s24 = scalar_lea.vmem %s334_s14, 2048  ;;  %s2162_s3 = smov [#allocation6]  }
  0x2a   : > { %p2907_p8 = pneg %p2339_p7  ;;  %p1818_p9 = scmp.ne.s32.totalorder %s334_s14, %s1817_s24 }
  0x2b   : > { %s1822_s6 = sshll.u32 %s2162_s3, 4  ;;  %s1823_s6 = int_to_ptr.vmem [resolvable:$false] %s1822_s6 }
  0x2c   : > { %p1820_p10 = pnand %p1818_p9, %p2907_p8  ;;  %s1824_s7 = scalar_lea.vmem %s1823_s6, 4096 }
  0x2d   : > { %s332_s15 = scalar_lea.hbm %s2947_s1, %s1504_s8  ;;  %p1825_p12 = scmp.lt.s32.totalorder %s334_s14, %s1823_s6 }
  0x2e   : > { %p1821_p11 = pneg %p1820_p10  ;;  %p1826_p13 = scmp.lt.s32.totalorder %s1824_s7, %s1817_s24 }
  0x30   : > { %p1827_p2 = por %p1826_p13, %p1825_p12 }
  0x32   : > { %p1828_p4 = pnand %p1827_p2, %p1821_p11 }
  0x34   : > { %1831 = shalt.err (!%p1828_p4)
}
  0x35   : > { %s2904_s1 = smov 128   ;;  %s2906_s3 = smov 8  }
  0x36   : > { %1640 = dma.hbm_to_vmem [thread:$0]  (!%p2339_p7), %s332_s15, 2048, %s334_s14, %s2345_s21, %s2904_s1, %s2904_s1, %s2906_s3  }
  0x37   : > { %s2949_s2 = sld [smem:[#allocation40_spill]]  ;;  %s347_s23 = scalar_lea.vmem [#allocation8], %s2330_s26 }
  0x38   : > { %s354_s25 = sshll.u32 %s347_s23, 4  ;;  %p1465_p6 = scmp.ge.s32.totalorder %s2160_s18, 1  ;;  %s2365_s25 = int_to_ptr.vmem [resolvable:$true] %s354_s25 }
  0x39   : > { %p406_p9 = scmp.lt.s32.totalorder %s2160_s18, 7  ;;  %s2373_s15 = sadd.s32 4294967295, %s2160_s18  }
  0x3a   : > { %s46_s23 = sadd.s32 1, %s2156_s17  ;;  %s53_s26 = sadd.s32 1, %s2140_s13 }
  0x3b   : > { %p2368_p10 = pnand %p1465_p6, %p406_p9  ;;  %s3027_s23 = smov (!%p2304_p1, %s46_s23), %s2156_s17 }
  0x3c   : > { %p60_p11 = scmp.ne.s32.totalorder %s2140_s13, %s2136_s12  ;;  %p48_p12 = scmp.ge.s32.totalorder %s3027_s23, 2 }
  0x3d   : > { %s2361_s7 = scalar_lea.hbm %s2949_s2, %s1504_s8  ;;  %p66_p13 = scmp.ne.s32.totalorder %s2136_s12, %s2132_s11 }
  0x3e   : > { %s2950_s14 = scalar_select %p2368_p10, 1, 0 }
  0x3f   : > { %p2390_p2 = por %p2905_p0, %p60_p11  ;;  %p2910_p4 = scmp.eq.s32.totalorder %s2373_s15, 0 }
  0x40   : > { %2951 = sst [smem:[#allocation31_spill]] %s2950_s14  ;;  %s3029_s23 = smov (%p48_p12, %s3027_s23), 0 }
  0x41   : > { %2953 = sst [smem:[#allocation32_spill]] %s3029_s23  ;;  %p2402_p1 = por %p2910_p4, %p66_p13 }
  0x42   : > { %p2411_p6 = por %p92_p3, %p2910_p4  ;;  %s50_s1 = ssub.s32 %s2156_s17, %s3029_s23 }
  0x43   : > { %s2954_s20 = scalar_select %p2402_p1, 1, 0 }
  0x44   : > { %s2956_s6 = scalar_select %p2411_p6, 1, 0 }
  0x45   : > { %2955 = sst [smem:[#allocation33_spill]] %s2954_s20  ;;  %p2923_p9 = scmp.eq.s32.totalorder %s2373_s15, 5 }
  0x46   : > { %2957 = sst [smem:[#allocation34_spill]] %s2956_s6  ;;  %p51_p0 = scmp.eq.s32.totalorder %s50_s1, 0 }
  0x47   : > { %s182_s3 = sor.u32 %s2321_s22, %s50_s1  ;;  %s2959_s2 = sadd.s32 4294967294, %s2160_s18  }
  0x48   : > { %p2419_p12 = scmp.eq.s32.totalorder %s182_s3, 0  ;;  %p2425_p8 = scmp.eq.s32.totalorder %s2959_s2, 5 }
  0x49   : > { %s2430_s30 = scalar_select %p51_p0, %s2140_s13, %s53_s26  }
  0x4a   : > { %p2437_p3 = por %p2923_p9, %p60_p11  ;;  %p2446_p4 = por %p2425_p8, %p66_p13 }
  0x4b   : > { %2961 = sst [smem:[#allocation35_spill]] %s2430_s30  ;;  %s304_s22 = sand.u32 1, %s2140_s13  }
  0x4c   : > { %s2962_s23 = scalar_select %p2437_p3, 1, 0 }
  0x4d   : > { %s2964_s1 = scalar_select %p2446_p4, 1, 0 }
  0x4e   : > { %2963 = sst [smem:[#allocation36_spill]] %s2962_s23  ;;  %s1453_s2 = sshll.u32 %s2156_s17, 7 }
  0x4f   : > { %2965 = sst [smem:[#allocation37_spill]] %s2964_s1  ;;  %s1452_s3 = sshll.u32 %s304_s22, 3 }
  0x50   : > { %p2456_p6 = pnand %p2922_p5, %p2390_p2  ;;  %s2967_s4 = sld [smem:[#allocation42_spill]] }
  0x51   : > { %s374_s23 = scalar_lea.vmem [#allocation9], %s1452_s3  ;;  %s2968_s20 = sand.u32 1, %s2160_s18  }
  0x52   : > { %s381_s9 = sshll.u32 %s374_s23, 4  ;;  %s2465_s1 = scalar_lea.sflag [#allocation10], %s2968_s20  ;;  %s382_s9 = int_to_ptr.vmem [resolvable:$true] %s381_s9 }
  0x53   : > { %p1834_p0 = pneg %p2456_p6  ;;  %s1845_s24 = scalar_lea.vmem %s382_s9, 128 }
  0x54   : > { %p1846_p11 = scmp.ne.s32.totalorder %s382_s9, %s1845_s24  ;;  %s2165_s13 = smov [#allocation9]  }
  0x55   : > { %s1850_s12 = sshll.u32 %s2165_s13, 4  ;;  %s1851_s12 = int_to_ptr.vmem [resolvable:$false] %s1850_s12 }
  0x56   : > { %s379_s11 = scalar_lea.hbm %s2967_s4, %s1453_s2  ;;  %p1848_p13 = pnand %p1846_p11, %p1834_p0 }
  0x57   : > { %s1852_s6 = scalar_lea.vmem %s1851_s12, 256  ;;  %p1853_p5 = scmp.lt.s32.totalorder %s382_s9, %s1851_s12 }
  0x58   : > { %p1849_p2 = pneg %p1848_p13  ;;  %p1854_p9 = scmp.lt.s32.totalorder %s1852_s6, %s1845_s24 }
  0x5a   : > { %p1855_p4 = por %p1854_p9, %p1853_p5 }
  0x5c   : > { %p1856_p3 = pnand %p1855_p4, %p1849_p2 }
  0x5e   : > { %1859 = shalt.err (!%p1856_p3)
}
  0x5f   : > { %1646 = dma.hbm_to_vmem [thread:$0]  (!%p2456_p6), %s379_s11, 128, %s382_s9, %s2465_s1  }
  0x60   : > { %s2969_s0 = sld [smem:[#allocation38_spill]]  ;;  %s308_s4 = scalar_lea.vmem [#allocation3], %s1452_s3 }
  0x61   : > { %s315_s14 = sshll.u32 %s308_s4, 4  ;;  %s305_s13 = scalar_lea.sflag [#allocation4], %s304_s22  ;;  %s316_s14 = int_to_ptr.vmem [resolvable:$true] %s315_s14 }
  0x62   : > { %s1873_s5 = scalar_lea.vmem %s316_s14, 128  ;;  %s2166_s12 = smov [#allocation3]  }
  0x63   : > { %p1874_p11 = scmp.ne.s32.totalorder %s316_s14, %s1873_s5  ;;  %s1878_s24 = sshll.u32 %s2166_s12, 4  ;;  %s1879_s24 = int_to_ptr.vmem [resolvable:$false] %s1878_s24 }
  0x64   : > { %s1880_s6 = scalar_lea.vmem %s1879_s24, 256  ;;  %p1881_p9 = scmp.lt.s32.totalorder %s316_s14, %s1879_s24 }
  0x65   : > { %p1876_p5 = pnand %p1874_p11, %p1834_p0  ;;  %p1882_p3 = scmp.lt.s32.totalorder %s1880_s6, %s1873_s5 }
  0x66   : > { %s313_s30 = scalar_lea.hbm %s2969_s0, %s1453_s2 }
  0x67   : > { %p1877_p4 = pneg %p1876_p5  ;;  %p1883_p13 = por %p1882_p3, %p1881_p9 }
  0x69   : > { %p1884_p2 = pnand %p1883_p13, %p1877_p4 }
  0x6b   : > { %1887 = shalt.err (!%p1884_p2)
}
  0x6c   : > { %1637 = dma.hbm_to_vmem [thread:$0]  (!%p2456_p6), %s313_s30, 128, %s316_s14, %s305_s13  }
  0x6d   : > { %s1901_s4 = scalar_lea.vmem %s2365_s25, 2048  ;;  %p2970_p0 = pneg %p2339_p7 }
  0x6e   : > { %p1902_p1 = scmp.ne.s32.totalorder %s2365_s25, %s1901_s4  ;;  %s2167_s9 = smov [#allocation8]  }
  0x6f   : > { %s1906_s22 = sshll.u32 %s2167_s9, 4  ;;  %s1907_s22 = int_to_ptr.vmem [resolvable:$false] %s1906_s22 }
  0x70   : > { %p1904_p11 = pnand %p1902_p1, %p2970_p0  ;;  %s1908_s5 = scalar_lea.vmem %s1907_s22, 4096 }
  0x71   : > { %p1909_p9 = scmp.lt.s32.totalorder %s2365_s25, %s1907_s22  ;;  %p1910_p4 = scmp.lt.s32.totalorder %s1908_s5, %s1901_s4 }
  0x72   : > { %p1905_p5 = pneg %p1904_p11 }
  0x73   : > { %p1911_p3 = por %p1910_p4, %p1909_p9 }
  0x75   : > { %p1912_p13 = pnand %p1911_p3, %p1905_p5 }
  0x77   : > { %1915 = shalt.err (!%p1912_p13)
}
  0x78   : > { %s2971_s2 = smov 8   ;;  %s2972_s3 = smov 128  }
  0x79   : > { %1643 = dma.hbm_to_vmem [thread:$0]  (!%p2339_p7), %s2361_s7, 2048, %s2365_s25, %s2345_s21, %s2972_s3, %s2972_s3, %s2971_s2  }
  0x7a   : > { %s185_s19 = sadd.s32 1, %s2116_s29  ;;  %p192_p1 = scmp.ne.s32.totalorder %s2116_s29, %s2112_s28 }
  0x7b   : > { %s2501_s14 = scalar_select %p2419_p12, %s2116_s29, %s185_s19  }
  0x7c   : > { %p198_p6 = scmp.ne.s32.totalorder %s2112_s28, %s2108_s27  ;;  %s390_s26 = sand.u32 1, %s2116_s29  }
  0x7d   : > { %s1463_s11 = sshll.u32 %s2152_s16, 1  ;;  %p2973_p2 = scmp.eq.s32.totalorder %s2160_s18, 0 }
  0x7e   : > { %p2974_p11 = scmp.eq.s32.totalorder %s2373_s15, 0  ;;  %p2976_p9 = scmp.eq.s32.totalorder %s2373_s15, 5 }
  0x7f   : > { %p194_p0 = por %p192_p1, %p2973_p2  ;;  %p2525_p7 = por %p2425_p8, %p198_p6 }
  0x80   : > { %p2513_p5 = por %p198_p6, %p2974_p11  ;;  %p2519_p4 = por %p2976_p9, %p192_p1 }
  0x81   : > { %s2978_s25 = scalar_select %p2525_p7, 1, 0 }
  0x82   : > { %s1462_s21 = sshll.u32 %s390_s26, 3  ;;  %s397_s7 = sadd.s32 %s2156_s17, %s1463_s11 }
  0x83   : > { %s1464_s8 = sshll.u32 %s397_s7, 7  ;;  %s2979_s12 = sld [smem:[#allocation43_spill]] }
  0x84   : > { %s392_s6 = scalar_lea.vmem [#allocation11], %s1462_s21  ;;  %p2980_p12 = scmp.lt.s32.totalorder %s2160_s18, 6 }
  0x85   : > { %s401_s4 = sshll.u32 %s392_s6, 4  ;;  %s2168_s22 = smov [#allocation11]   ;;  %s402_s4 = int_to_ptr.vmem [resolvable:$true] %s401_s4 }
  0x86   : > { %p2535_p3 = pnand %p2980_p12, %p194_p0  ;;  %s1929_s10 = scalar_lea.vmem %s402_s4, 128 }
  0x87   : > { %p1930_p13 = scmp.ne.s32.totalorder %s402_s4, %s1929_s10  ;;  %s1934_s5 = sshll.u32 %s2168_s22, 4  ;;  %s1935_s5 = int_to_ptr.vmem [resolvable:$false] %s1934_s5 }
  0x88   : > { %p1918_p8 = pneg %p2535_p3  ;;  %s1936_s2 = scalar_lea.vmem %s1935_s5, 256 }
  0x89   : > { %s399_s24 = scalar_lea.hbm %s2979_s12, %s1464_s8  ;;  %p1937_p2 = scmp.lt.s32.totalorder %s402_s4, %s1935_s5 }
  0x8a   : > { %p1932_p1 = pnand %p1930_p13, %p1918_p8  ;;  %p1938_p11 = scmp.lt.s32.totalorder %s1936_s2, %s1929_s10 }
  0x8c   : > { %p1933_p6 = pneg %p1932_p1  ;;  %p1939_p9 = por %p1938_p11, %p1937_p2 }
  0x8e   : > { %p1940_p7 = pnand %p1939_p9, %p1933_p6 }
  0x90   : > { %1943 = shalt.err (!%p1940_p7)
}
  0x91   : > { %1649 = dma.hbm_to_vmem [thread:$0]  (!%p2535_p3), %s399_s24, 128, %s402_s4, %s2465_s1  }
  0x92   : > { %410 = sbr.rel (%p2368_p10) target bundleno = 998 (0x3e6), region = 44  ;;  %s2983_s19 = sld [smem:[#allocation25_spill]] (!%p2368_p10) }
  0x93   : > { %s2984_s26 = sld [smem:[#allocation33_spill]] (!%p2368_p10) }
  0x98   : > { %s412_s11 = sand.u32 1, %s2983_s19  }
  0x99   : > { %s2547_s21 = sshll.u32 %s412_s11, 3  ;;  %s413_s7 = scalar_lea.sflag [#allocation4], %s412_s11 }
  0x9a   : > { %s416_s8 = scalar_lea.vmem [#allocation3], %s2547_s21  ;;  %p2985_p0 = scmp.ne.s32.totalorder %s2984_s26, 0 }
  0x9c   : > { %2079 = dma.done.wait (%p2985_p0), %s413_s7, 128  }
  0x9d   : > { %2081 = vsyncadd (%p2985_p0), %s413_s7, 4294967168  ;;  %s2986_s30 = sld [smem:[#allocation23_spill]]  ;;  %s2555_s1 = sand.u32 1, %s2373_s15  }
  0x9e   : > { %s2987_s13 = sld [smem:[#allocation34_spill]]  ;;  %s422_s6 = scalar_lea.sflag [#allocation7], %s2555_s1 }
  0xa3   : > { %s423_s12 = sand.u32 1, %s2986_s30  }
  0xa4   : > { %s1467_s24 = sshll.u32 %s423_s12, 7  ;;  %p2988_p10 = scmp.ne.s32.totalorder %s2987_s13, 0 }
  0xa5   : > { %s2559_s4 = scalar_lea.vmem [#allocation6], %s1467_s24 }
  0xa6   : > { %2083 = dma.done.wait (%p2988_p10), %s422_s6, 4096  }
  0xa7   : > { %2085 = vsyncadd (%p2988_p10), %s422_s6, 4294963200  ;;  %s2565_s9 = scalar_lea.vmem [#allocation8], %s1467_s24  ;;  %s440_s10 = scalar_lea.sflag [#allocation10], %s2555_s1 }
  0xa8   : > { %s443_s22 = scalar_lea.vmem [#allocation9], %s2547_s21 }
  0xa9   : > { %2087 = dma.done.wait (%p2985_p0), %s440_s10, 128  }
  0xaa   : > { %2089 = vsyncadd (%p2985_p0), %s440_s10, 4294967168  ;;  %s2928_s15 = sand.u32 1, %s2112_s28  }
  0xab   : > { %s2576_s5 = sshll.u32 %s2928_s15, 3 }
  0xac   : > { %s452_s2 = scalar_lea.vmem [#allocation11], %s2576_s5 }
  0xad   : > { %2091 = dma.done.wait (%p2513_p5), %s440_s10, 128  }
  0xae   : > { %2093 = vsyncadd (%p2513_p5), %s440_s10, 4294967168  ;;  %s2989_s3 = sld [smem:[#allocation27_spill]]  ;;  %s503_s13 = scalar_lea.vmem [#allocation12], %s2576_s5 }
  0xaf   : > { %s2990_s7 = sld [smem:[#allocation41_spill]]  ;;  %s510_s12 = scalar_lea.vmem [#allocation13], %s2576_s5 }
  0xb0   : > { %s2927_s24 = scalar_lea.vmem [#allocation15], %s2547_s21 }
  0xb4   : > { %p518_p7 = scmp.lt.s32.totalorder %s2989_s3, 2  ;;  %p1474_p12 = scmp.ne.s32.totalorder %s2989_s3, 0 }
  0xb6   : > { %s2585_s19 = scalar_select %p518_p7, %s2989_s3, 2 }
  0xb7   : > { %524 = sbr.rel (%p1474_p12) target bundleno = 190 (0xbe), region = 68 }
  0xb8   : > { %s520_s30 = scalar_lea.vmem %s2990_s7, %s2585_s19 }
  0xbc   : > { %v525_v0 = vld [vmem:[%s416_s8] sm:$0xff] }
  0xbd   : > { %526 = vst [vmem:[#allocation2] sm:$0xff] %v525_v0 }
  0xbe PF: > { %v755_v1 = vld [vmem:[%s2559_s4 + $0x78] sm:$0xff]  ;;  %v2169_v2 = vmov 0.0   ;;  %v754_v3 = vld [vmem:[%s2559_s4 + $0x70] sm:$0xff]  ;;  %vm2170_vm0 = vmmov 0   ;;  %v753_v4 = vld [vmem:[%s2559_s4 + $0x68] sm:$0xff] }
  0xbf   : > { %1540 = vmatprep.subr.mxu0 %v2169_v2  ;;  %1572 = vmatprep.mubr.msk.f32.mxu0 %vm2170_vm0, %v2169_v2  ;;  %v752_v5 = vld [vmem:[%s2559_s4 + $0x60] sm:$0xff]  ;;  %v845_v8 = vld [vmem:[%s2565_s9 + $0x78] sm:$0xff]  ;;  %v844_v9 = vld [vmem:[%s2565_s9 + $0x70] sm:$0xff]  ;;  %v2171_v31 = vmov 683565275  }
  0xc0   : > { %1541 = vmatpush3.msra.mxu0 %v755_v1  ;;  %1575 = vmatprep.subr.mxu1 %v2169_v2  ;;  %v751_v10 = vld [vmem:[%s2559_s4 + $0x58] sm:$0xff]  ;;  %v843_v12 = vld [vmem:[%s2565_s9 + $0x68] sm:$0xff]  ;;  %v750_v13 = vld [vmem:[%s2559_s4 + $0x50] sm:$0xff]  ;;  %v2172_v33 = vmov 2475754826  }
  0xc1   : > { %1542 = vmatprep.subr.mxu0 %v2169_v2  ;;  %1607 = vmatprep.mubr.msk.f32.mxu1 %vm2170_vm0, %v2169_v2  ;;  %v842_v16 = vld [vmem:[%s2565_s9 + $0x60] sm:$0xff]  ;;  %v749_v17 = vld [vmem:[%s2559_s4 + $0x48] sm:$0xff]  ;;  %v841_v19 = vld [vmem:[%s2565_s9 + $0x58] sm:$0xff]  ;;  %v2173_v35 = vmov 2131351028  }
  0xc2   : > { %1543 = vmatpush3.msra.mxu0 %v754_v3  ;;  %1576 = vmatpush3.msra.mxu1 %v845_v8  ;;  %v748_v20 = vld [vmem:[%s2559_s4 + $0x40] sm:$0xff]  ;;  %v840_v22 = vld [vmem:[%s2565_s9 + $0x50] sm:$0xff]  ;;  %v747_v23 = vld [vmem:[%s2559_s4 + $0x38] sm:$0xff]  ;;  %v2174_v38 = vmov 2102212464  }
  0xc3   : > { %1544 = vmatprep.subr.mxu0 %v2169_v2  ;;  %1577 = vmatprep.subr.mxu1 %v2169_v2  ;;  %v839_v26 = vld [vmem:[%s2565_s9 + $0x48] sm:$0xff]  ;;  %v746_v27 = vld [vmem:[%s2559_s4 + $0x30] sm:$0xff]  ;;  %v2175_v40 = vmov 920167782   ;;  %v838_v42 = vld [vmem:[%s2565_s9 + $0x40] sm:$0xff] }
  0xc4   : > { %v2605_v6 = vld [vmem:[#allocation2] sm:$0xff]  ;;  %1545 = vmatpush3.msra.mxu0 %v753_v4  ;;  %1578 = vmatpush3.msra.mxu1 %v844_v9  ;;  %v744_v47 = vld [vmem:[%s2559_s4 + $0x20] sm:$0xff]  ;;  %v2176_v49 = vmov 1326507024   ;;  %v837_v52 = vld [vmem:[%s2565_s9 + $0x38] sm:$0xff] }
  0xc5   : > { %v534_v7 = vand.u32 2139095040, %v2605_v6  ;;  %1546 = vmatprep.subr.mxu0 %v2169_v2  ;;  %v531_v14 = vand.u32 2147483647, %v2605_v6  ;;  %1579 = vmatprep.subr.mxu1 %v2169_v2  ;;  %v745_v37 = vld [vmem:[%s2559_s4 + $0x28] sm:$0xff]  ;;  %v743_v56 = vld [vmem:[%s2559_s4 + $0x18] sm:$0xff]  ;;  %v836_v59 = vld [vmem:[%s2565_s9 + $0x30] sm:$0xff]  ;;  %vm623_vm0 = vweird.f32 %v2605_v6 }
  0xc6   : > { %1547 = vmatpush3.msra.mxu0 %v752_v5  ;;  %1580 = vmatpush3.msra.mxu1 %v843_v12  ;;  %v742_v0 = vld [vmem:[%s2559_s4 + $0x10] sm:$0xff]  ;;  %v835_v5 = vld [vmem:[%s2565_s9 + $0x28] sm:$0xff]  ;;  %vm533_vm8 = vcmp.lt.s32.totalorder %v2605_v6, 0 }
  0xc7   : > { %v535_v11 = vshrl.u32 %v534_v7, 23  ;;  %1548 = vmatprep.subr.mxu0 %v2169_v2  ;;  %1581 = vmatprep.subr.mxu1 %v2169_v2  ;;  %v538_v21 = vand.u32 8388607, %v531_v14  ;;  %v741_v9 = vld [vmem:[%s2559_s4 + $0x8] sm:$0xff]  ;;  %vm532_vm9 = vcmp.le.f32.partialorder %v531_v14, 0.7853982 }
  0xc8   : > { %1549 = vmatpush3.msra.mxu0 %v751_v10  ;;  %1582 = vmatpush3.msra.mxu1 %v842_v16 }
  0xc9   : > { %v1475_v15 = vadd.s32 4294967169, %v535_v11  ;;  %1550 = vmatprep.subr.mxu0 %v2169_v2  ;;  %1583 = vmatprep.subr.mxu1 %v2169_v2  ;;  %v539_v28 = vor.u32 8388608, %v538_v21 }
  0xca   : > { %1551 = vmatpush3.msra.mxu0 %v750_v13  ;;  %1584 = vmatpush3.msra.mxu1 %v841_v19  ;;  %v834_v13 = vld [vmem:[%s2565_s9 + $0x20] sm:$0xff] }
  0xcb   : > { %v541_v18 = vadd.s32 1, %v1475_v15  ;;  %1552 = vmatprep.subr.mxu0 %v2169_v2  ;;  %1585 = vmatprep.subr.mxu1 %v2169_v2  ;;  %v579_v51 = vshll.u32 %v539_v28, 8  ;;  %v740_v19 = vld [vmem:[%s2559_s4] sm:$0xff]  ;;  %s2992_s4 = sld [smem:[#allocation27_spill]] }
  0xcc   : > { %1553 = vmatpush3.msra.mxu0 %v749_v17  ;;  %1586 = vmatpush3.msra.mxu1 %v840_v22 }
  0xcd   : > { %vm542_vm1 = vcmp.gt.s32.totalorder %v541_v18, 0  ;;  %1554 = vmatprep.subr.mxu0 %v2169_v2  ;;  %1587 = vmatprep.subr.mxu1 %v2169_v2 }
  0xce   : > { %v543_v24 = vsel %vm542_vm1, %v541_v18, 0  ;;  %1555 = vmatpush3.msra.mxu0 %v748_v20  ;;  %1588 = vmatpush3.msra.mxu1 %v839_v26 }
  0xcf   : > { %v545_v25 = vand.u32 31, %v543_v24  ;;  %1556 = vmatprep.subr.mxu0 %v2169_v2  ;;  %v2635_v29 = vshrl.u32 %v543_v24, 5  ;;  %1589 = vmatprep.subr.mxu1 %v2169_v2 }
  0xd0   : > { %1557 = vmatpush3.msra.mxu0 %v747_v23  ;;  %1590 = vmatpush3.msra.mxu1 %v838_v42 }
  0xd1   : > { %v546_v30 = vsub.s32 32, %v545_v25  ;;  %v548_v32 = vshll.u32 %v2171_v31, %v545_v25  ;;  %v551_v34 = vshll.u32 %v2172_v33, %v545_v25  ;;  %v554_v36 = vshll.u32 %v2173_v35, %v545_v25  ;;  %1558 = vmatprep.subr.mxu0 %v2169_v2  ;;  %1591 = vmatprep.subr.mxu1 %v2169_v2  ;;  %p1485_p5 = scmp.ne.s32.totalorder %s2992_s4, 2 }
  0xd2   : > { %v557_v39 = vshll.u32 %v2174_v38, %v545_v25  ;;  %v560_v41 = vshll.u32 %v2175_v40, %v545_v25  ;;  %1559 = vmatpush3.msra.mxu0 %v746_v27  ;;  %vm563_vm2 = vcmp.lt.s32.totalorder %v2635_v29, 1  ;;  %vm566_vm3 = vcmp.lt.s32.totalorder %v2635_v29, 4  ;;  %1592 = vmatpush3.msra.mxu1 %v837_v52 }
  0xd3   : > { %v547_v43 = vshrl.u32 %v2171_v31, %v546_v30  ;;  %v549_v44 = vshrl.u32 %v2172_v33, %v546_v30  ;;  %v552_v45 = vshrl.u32 %v2173_v35, %v546_v30  ;;  %v555_v46 = vshrl.u32 %v2174_v38, %v546_v30  ;;  %1560 = vmatprep.subr.mxu0 %v2169_v2 }
  0xd4   : > { %v558_v48 = vshrl.u32 %v2175_v40, %v546_v30  ;;  %v561_v50 = vshrl.u32 %v2176_v49, %v546_v30  ;;  %1561 = vmatpush3.msra.mxu0 %v745_v37  ;;  %vm564_vm4 = vcmp.lt.s32.totalorder %v2635_v29, 2  ;;  %vm565_vm5 = vcmp.lt.s32.totalorder %v2635_v29, 3  ;;  %1593 = vmatprep.subr.mxu1 %v2169_v2 }
  0xd5   : > { %v550_v53 = vor.u32 %v549_v44, %v548_v32  ;;  %v553_v54 = vor.u32 %v552_v45, %v551_v34  ;;  %v556_v55 = vor.u32 %v555_v46, %v554_v36  ;;  %1562 = vmatprep.subr.mxu0 %v2169_v2  ;;  %1594 = vmatpush3.msra.mxu1 %v836_v59  ;;  %v528_v52 = vlaneseq }
  0xd6   : > { %v559_v57 = vor.u32 %v558_v48, %v557_v39  ;;  %v562_v58 = vor.u32 %v561_v50, %v560_v41  ;;  %1563 = vmatpush3.msra.mxu0 %v744_v47  ;;  %1595 = vmatprep.subr.mxu1 %v2169_v2 }
  0xd7   : > { %v567_v60 = vsel %vm563_vm2, %v547_v43, %v550_v53  ;;  %v568_v61 = vsel %vm566_vm3, %v556_v55, 2102212464  ;;  %v571_v62 = vsel %vm563_vm2, %v550_v53, %v553_v54  ;;  %v575_v63 = vsel %vm563_vm2, %v553_v54, %v556_v55  ;;  %1564 = vmatprep.subr.mxu0 %v2169_v2  ;;  %1596 = vmatpush3.msra.mxu1 %v835_v5  ;;  %v833_v5 = vld [vmem:[%s2565_s9 + $0x18] sm:$0xff] }
  0xd8   : > { %v569_v1 = vsel %vm565_vm5, %v553_v54, %v568_v61  ;;  %v572_v3 = vsel %vm566_vm3, %v559_v57, 920167782  ;;  %v576_v4 = vsel %vm566_vm3, %v562_v58, 1326507024  ;;  %1565 = vmatpush3.msra.mxu0 %v743_v56  ;;  %1597 = vmatprep.subr.mxu1 %v2169_v2  ;;  %v2704_v56 = vand.u32 127, %v528_v52 }
  0xd9   : > { %v573_v7 = vsel %vm565_vm5, %v556_v55, %v572_v3  ;;  %v577_v8 = vsel %vm565_vm5, %v559_v57, %v576_v4  ;;  %1566 = vmatprep.subr.mxu0 %v2169_v2  ;;  %v570_v10 = vsel %vm564_vm4, %v567_v60, %v569_v1  ;;  %1598 = vmatpush3.msra.mxu1 %v834_v13 }
  0xda   : > { %v574_v11 = vsel %vm564_vm4, %v571_v62, %v573_v7  ;;  %v578_v12 = vsel %vm564_vm4, %v575_v63, %v577_v8  ;;  %1567 = vmatpush3.msra.mxu0 %v742_v0  ;;  %v586_v20 = vmul.u32 %v579_v51, %v570_v10  ;;  %1599 = vmatprep.subr.mxu1 %v2169_v2  ;;  %vm530_vm1 = vcmp.lt.s32.totalorder %v2704_v56, 8  ;;  %v832_v7 = vld [vmem:[%s2565_s9 + $0x10] sm:$0xff]  ;;  %v831_v8 = vld [vmem:[%s2565_s9 + $0x8] sm:$0xff] }
  0xdb   : > { %v2685_v15 = vmul.u32.u64.low %v579_v51, %v578_v12  ;;  %v2686_v16 = vmul.u32.u64.high %v579_v51, %v578_v12, %v2685_v15  ;;  %v2688_v17 = vmul.u32.u64.low %v579_v51, %v574_v11  ;;  %v2689_v18 = vmul.u32.u64.high %v579_v51, %v574_v11, %v2688_v17  ;;  %1568 = vmatprep.subr.mxu0 %v2169_v2  ;;  %1600 = vmatpush3.msra.mxu1 %v833_v5  ;;  %v756_v10 = vld [vmem:[%s443_s22] sm:$0xff]  ;;  %v827_v12 = vld [vmem:[%s452_s2] sm:$0xff] }
  0xdc   : > { %1569 = vmatpush3.msra.mxu0 %v741_v9  ;;  %1601 = vmatprep.subr.mxu1 %v2169_v2  ;;  %v830_v9 = vld [vmem:[%s2565_s9] sm:$0xff] }
  0xdd   : > { %1570 = vmatprep.subr.mxu0 %v2169_v2  ;;  %vm588_vm6 = vc.u32 %v2686_v16, %v2688_v17  ;;  %v589_v21 = vadd.s32 1, %v2689_v18  ;;  %v587_v32 = vadd.s32 %v2688_v17, %v2686_v16  ;;  %1602 = vmatpush3.msra.mxu1 %v832_v7 }
  0xde   : > { %1571 = vmatpush3.msra.mxu0 %v740_v19  ;;  %1603 = vmatprep.subr.mxu1 %v2169_v2 }
  0xdf   : > { %v590_v22 = vsel %vm588_vm6, %v589_v21, %v2689_v18  ;;  %1604 = vmatpush3.msra.mxu1 %v831_v8  ;;  %v2177_v18 = vmov 16  }
  0xe0   : > { %v591_v23 = vadd.s32 %v590_v22, %v586_v20  ;;  %1605 = vmatprep.subr.mxu1 %v2169_v2  ;;  %1791 = vset.pattern.permute.xlu0 %v2177_v18  ;;  %v1483_v2 = vld [vmem:[%s520_s30] ss:$0 sm:$0xff] }
  0xe1   : > { %1606 = vmatpush3.msra.mxu1 %v830_v9 }
  0xe2   : > { %v592_v24 = vadd.s32 536870912, %v591_v23 }
  0xe4   : > { %v593_v25 = vshrl.u32 %v592_v24, 30 }
  0xe6   : > { %v594_v26 = vshll.u32 %v593_v25, 30  ;;  %v617_v45 = vsub.s32 4, %v593_v25 }
  0xe8   : > { %v595_v27 = vsub.s32 %v591_v23, %v594_v26  ;;  %v618_v48 = vsel %vm533_vm8, %v617_v45, %v593_v25 }
  0xe9   : > { %v620_v50 = vsel %vm532_vm9, 0, %v618_v48 }
  0xea   : > { %v597_v28 = vsub.s32 0, %v595_v27  ;;  %v727_v51 = vadd.s32 3, %v620_v50  ;;  %v624_v53 = vand.u32 3, %v620_v50 }
  0xec   : > { %v1476_v29 = vmin.u32 %v597_v28, %v595_v27  ;;  %v728_v54 = vand.u32 3, %v727_v51  ;;  %vm629_vm10 = vcmp.eq.s32.totalorder %v624_v53, 2  ;;  %vm626_vm12 = vcmp.eq.s32.totalorder %v624_v53, 0 }
  0xed   : > { %vm625_vm14 = vcmp.lt.s32.totalorder %v624_v53, 2 }
  0xee   : > { %v599_v30 = vclz %v1476_v29  ;;  %vm733_vm11 = vcmp.eq.s32.totalorder %v728_v54, 2  ;;  %vm730_vm13 = vcmp.eq.s32.totalorder %v728_v54, 0  ;;  %vm729_vm15 = vcmp.lt.s32.totalorder %v728_v54, 2 }
  0xf0   : > { %v1477_v31 = vadd.s32 4294967294, %v599_v30 }
  0xf2   : > { %vm1478_vm7 = vcmp.lt.s32.totalorder %v1477_v31, 0 }
  0xf3   : > { %v602_v33 = vsel %vm1478_vm7, 0, %v1477_v31 }
  0xf4   : > { %v603_v34 = vsub.s32 32, %v602_v33  ;;  %v604_v35 = vshll.u32 %v595_v27, %v602_v33  ;;  %v607_v36 = vsub.s32 4294967266, %v602_v33 }
  0xf6   : > { %v605_v37 = vshrl.u32 %v587_v32, %v603_v34  ;;  %v608_v38 = vadd.s32 127, %v607_v36 }
  0xf8   : > { %v606_v39 = vor.u32 %v605_v37, %v604_v35  ;;  %v609_v40 = vshll.u32 %v608_v38, 23 }
  0xfa   : > { %v610_v41 = vor.u32 4788187, %v609_v40  ;;  %v613_v42 = vcvt.s32.f32 %v606_v39 }
  0xfc   : > { %v611_v43 = vand.u32 2147483647, %v610_v41 }
  0xfe   : > { %v614_v44 = vmul.f32 %v613_v42, %v611_v43 }
 0x100   : > { %v615_v46 = vxor.u32 2147483648, %v614_v44 }
 0x102   : > { %v616_v47 = vsel %vm533_vm8, %v615_v46, %v614_v44 }
 0x103   : > { %v619_v49 = vsel %vm532_vm9, %v2605_v6, %v616_v47 }
 0x104   : > { %1792 = vcosq.f32 %v619_v49 }
 0x105   : > { %1794 = vsinq.f32 %v619_v49 }
 0x111   : > { %v1793_v55 = vpop.eup %1792 }
 0x112   : > { %v1795_v57 = vpop.eup %1794  ;;  %v630_v14 = vxor.u32 2147483648, %v1793_v55 }
 0x113   : > { %v627_v58 = vxor.u32 2147483648, %v1795_v57 }
 0x114   : > { %v631_v59 = vsel %vm629_vm10, %v630_v14, %v1795_v57  ;;  %v735_v60 = vsel %vm733_vm11, %v630_v14, %v1795_v57 }
 0x115   : > { %v628_v61 = vsel %vm626_vm12, %v1793_v55, %v627_v58  ;;  %v732_v62 = vsel %vm730_vm13, %v1793_v55, %v627_v58 }
 0x116   : > { %v632_v63 = vsel %vm625_vm14, %v628_v61, %v631_v59  ;;  %v736_v0 = vsel %vm729_vm15, %v732_v62, %v735_v60 }
 0x117   : > { %v633_v1 = vsel %vm623_vm0, nan, %v632_v63  ;;  %v737_v3 = vsel %vm623_vm0, nan, %v736_v0 }
 0x118   : > { %v738_v4 = vsel %vm530_vm1, %v633_v1, %v737_v3 }
 0x119   : > { %739 = vst [vmem:[%s503_s13] sm:$0xff] %v738_v4  ;;  %1573 = vmatmul.mubr.f32.vlgmr.msra.gmra.mxu0 %v738_v4 }
 0x1d9   : > { %v823_v11 = vpop.f32.mrf.mxu0 }
 0x1da   : > { %v824_v13 = vadd.f32 %v823_v11, %v756_v10 }
 0x1db   : > { %v1574_v15 = vpop.f32.mrf.mxu0 }
 0x1dc   : > { %v828_v16 = vadd.f32 %v827_v12, %v824_v13 }
 0x1de   : > { %v829_v17 = vmax.f32 %v828_v16, 0.0 }
 0x1e0   : > { %1608 = vmatmul.mubr.f32.vlgmr.msra.gmra.mxu1 %v829_v17 }
 0x2a0   : > { %v919_v19 = vpop.f32.mrf.mxu1 }
 0x2a1   : > { %v920_v20 = vadd.f32 %v1483_v2, %v919_v19 }
 0x2a2   : > { %v1609_v21 = vpop.f32.mrf.mxu1 }
 0x2a3   : > { %923 = vst [vmem:[%s510_s12] sm:$0xff] %v920_v20  ;;  %v1484_v22 = vmul.f32 -1.442695, %v920_v20 }
 0x2a5   : > { %1796 = vpow2.f32 %v1484_v22 }
 0x2b2   : > { %v1797_v23 = vpop.eup %1796 }
 0x2b3   : > { %v927_v24 = vadd.f32 1.0, %v1797_v23 }
 0x2b5   : > { %1798 = vrcp.f32 %v927_v24 }
 0x2c2   : > { %v1799_v25 = vpop.eup %1798 }
 0x2c3   : > { %932 = vperm.xlu0 %1791, %v1799_v25  }
 0x33e   : > { %v933_v26 = vpop.permute.xlu0 %932 }
 0x33f   : > { %v935_v27 = vmul.f32 %v933_v26, %v920_v20  ;;  %941 = sbr.rel (%p1485_p5) target bundleno = 921 (0x399), region = 72 }
 0x341   : > { %v2731_v28 = vsub.f32 %v2605_v6, %v935_v27 }
 0x343   : > { %937 = vst [vmem:[#allocation2] sm:$0xff] %v2731_v28 }
 0x344   : > { %v945_v29 = vand.u32 2139095040, %v2731_v28  ;;  %v942_v31 = vand.u32 2147483647, %v2731_v28  ;;  %v2178_v39 = vmov 683565275   ;;  %vm944_vm9 = vcmp.lt.s32.totalorder %v2731_v28, 0 }
 0x345   : > { %v2179_v41 = vmov 2475754826   ;;  %v2180_v43 = vmov 2131351028   ;;  %v2181_v45 = vmov 2102212464  }
 0x346   : > { %v946_v30 = vshrl.u32 %v945_v29, 23  ;;  %v949_v34 = vand.u32 8388607, %v942_v31  ;;  %v2182_v47 = vmov 920167782  }
 0x347   : > { %v2183_v54 = vmov 1326507024   ;;  %vm943_vm10 = vcmp.le.f32.partialorder %v942_v31, 0.7853982 }
 0x348   : > { %v1486_v32 = vadd.s32 4294967169, %v946_v30  ;;  %v950_v6 = vor.u32 8388608, %v949_v34 }
 0x34a   : > { %v952_v33 = vadd.s32 1, %v1486_v32  ;;  %v990_v57 = vshll.u32 %v950_v6, 8 }
 0x34c   : > { %vm953_vm2 = vcmp.gt.s32.totalorder %v952_v33, 0 }
 0x34d   : > { %v954_v35 = vsel %vm953_vm2, %v952_v33, 0  ;;  %vm1034_vm2 = vweird.f32 %v2731_v28 }
 0x34e   : > { %v956_v36 = vand.u32 31, %v954_v35  ;;  %v955_v37 = vshrl.u32 %v954_v35, 5 }
 0x350   : > { %v957_v38 = vsub.s32 32, %v956_v36  ;;  %v959_v40 = vshll.u32 %v2178_v39, %v956_v36  ;;  %v962_v42 = vshll.u32 %v2179_v41, %v956_v36  ;;  %v965_v44 = vshll.u32 %v2180_v43, %v956_v36 }
 0x351   : > { %v968_v46 = vshll.u32 %v2181_v45, %v956_v36  ;;  %v971_v48 = vshll.u32 %v2182_v47, %v956_v36  ;;  %vm974_vm3 = vcmp.lt.s32.totalorder %v955_v37, 1  ;;  %vm977_vm4 = vcmp.lt.s32.totalorder %v955_v37, 4 }
 0x352   : > { %v958_v49 = vshrl.u32 %v2178_v39, %v957_v38  ;;  %v960_v50 = vshrl.u32 %v2179_v41, %v957_v38  ;;  %v963_v51 = vshrl.u32 %v2180_v43, %v957_v38  ;;  %v966_v52 = vshrl.u32 %v2181_v45, %v957_v38 }
 0x353   : > { %v969_v53 = vshrl.u32 %v2182_v47, %v957_v38  ;;  %v972_v55 = vshrl.u32 %v2183_v54, %v957_v38  ;;  %vm975_vm5 = vcmp.lt.s32.totalorder %v955_v37, 2  ;;  %vm976_vm6 = vcmp.lt.s32.totalorder %v955_v37, 3 }
 0x354   : > { %v961_v14 = vor.u32 %v960_v50, %v959_v40  ;;  %v964_v58 = vor.u32 %v963_v51, %v962_v42  ;;  %v967_v59 = vor.u32 %v966_v52, %v965_v44 }
 0x355   : > { %v970_v60 = vor.u32 %v969_v53, %v968_v46  ;;  %v973_v61 = vor.u32 %v972_v55, %v971_v48 }
 0x356   : > { %v978_v62 = vsel %vm974_vm3, %v958_v49, %v961_v14  ;;  %v979_v63 = vsel %vm977_vm4, %v967_v59, 2102212464  ;;  %v982_v0 = vsel %vm974_vm3, %v961_v14, %v964_v58  ;;  %v986_v1 = vsel %vm974_vm3, %v964_v58, %v967_v59 }
 0x357   : > { %v980_v3 = vsel %vm976_vm6, %v964_v58, %v979_v63  ;;  %v983_v4 = vsel %vm977_vm4, %v970_v60, 920167782  ;;  %v987_v5 = vsel %vm977_vm4, %v973_v61, 1326507024 }
 0x358   : > { %v984_v7 = vsel %vm976_vm6, %v967_v59, %v983_v4  ;;  %v988_v8 = vsel %vm976_vm6, %v970_v60, %v987_v5  ;;  %v981_v9 = vsel %vm975_vm5, %v978_v62, %v980_v3 }
 0x359   : > { %v985_v10 = vsel %vm975_vm5, %v982_v0, %v984_v7  ;;  %v989_v11 = vsel %vm975_vm5, %v986_v1, %v988_v8  ;;  %v997_v17 = vmul.u32 %v990_v57, %v981_v9 }
 0x35a   : > { %v2739_v12 = vmul.u32.u64.low %v990_v57, %v989_v11  ;;  %v2740_v13 = vmul.u32.u64.high %v990_v57, %v989_v11, %v2739_v12  ;;  %v2742_v15 = vmul.u32.u64.low %v990_v57, %v985_v10  ;;  %v2743_v16 = vmul.u32.u64.high %v990_v57, %v985_v10, %v2742_v15 }
 0x35c   : > { %vm999_vm7 = vc.u32 %v2740_v13, %v2742_v15  ;;  %v1000_v18 = vadd.s32 1, %v2743_v16  ;;  %v998_v29 = vadd.s32 %v2742_v15, %v2740_v13 }
 0x35e   : > { %v1001_v2 = vsel %vm999_vm7, %v1000_v18, %v2743_v16 }
 0x35f   : > { %v1002_v19 = vadd.s32 %v1001_v2, %v997_v17 }
 0x361   : > { %v1003_v20 = vadd.s32 536870912, %v1002_v19 }
 0x363   : > { %v1004_v21 = vshrl.u32 %v1003_v20, 30 }
 0x365   : > { %v1005_v22 = vshll.u32 %v1004_v21, 30  ;;  %v1028_v42 = vsub.s32 4, %v1004_v21 }
 0x367   : > { %v1006_v23 = vsub.s32 %v1002_v19, %v1005_v22  ;;  %v1029_v45 = vsel %vm944_vm9, %v1028_v42, %v1004_v21 }
 0x368   : > { %v1031_v47 = vsel %vm943_vm10, 0, %v1029_v45 }
 0x369   : > { %v1008_v24 = vsub.s32 0, %v1006_v23  ;;  %v1138_v48 = vadd.s32 3, %v1031_v47  ;;  %v1035_v49 = vand.u32 3, %v1031_v47 }
 0x36b   : > { %v1487_v25 = vmin.u32 %v1008_v24, %v1006_v23  ;;  %v1139_v50 = vand.u32 3, %v1138_v48  ;;  %vm1040_vm11 = vcmp.eq.s32.totalorder %v1035_v49, 2  ;;  %vm1037_vm13 = vcmp.eq.s32.totalorder %v1035_v49, 0 }
 0x36c   : > { %vm1036_vm15 = vcmp.lt.s32.totalorder %v1035_v49, 2 }
 0x36d   : > { %v1010_v26 = vclz %v1487_v25  ;;  %vm1144_vm12 = vcmp.eq.s32.totalorder %v1139_v50, 2  ;;  %vm1141_vm14 = vcmp.eq.s32.totalorder %v1139_v50, 0  ;;  %vm1140_vm0 = vcmp.lt.s32.totalorder %v1139_v50, 2 }
 0x36f   : > { %v1488_v27 = vadd.s32 4294967294, %v1010_v26 }
 0x371   : > { %vm1489_vm8 = vcmp.lt.s32.totalorder %v1488_v27, 0 }
 0x372   : > { %v1013_v30 = vsel %vm1489_vm8, 0, %v1488_v27 }
 0x373   : > { %v1014_v32 = vsub.s32 32, %v1013_v30  ;;  %v1015_v33 = vshll.u32 %v1006_v23, %v1013_v30  ;;  %v1018_v34 = vsub.s32 4294967266, %v1013_v30 }
 0x375   : > { %v1016_v35 = vshrl.u32 %v998_v29, %v1014_v32  ;;  %v1019_v36 = vadd.s32 127, %v1018_v34 }
 0x377   : > { %v1017_v6 = vor.u32 %v1016_v35, %v1015_v33  ;;  %v1020_v37 = vshll.u32 %v1019_v36, 23 }
 0x379   : > { %v1021_v38 = vor.u32 4788187, %v1020_v37  ;;  %v1024_v39 = vcvt.s32.f32 %v1017_v6 }
 0x37b   : > { %v1022_v40 = vand.u32 2147483647, %v1021_v38 }
 0x37d   : > { %v1025_v41 = vmul.f32 %v1024_v39, %v1022_v40 }
 0x37f   : > { %v1026_v43 = vxor.u32 2147483648, %v1025_v41 }
 0x381   : > { %v1027_v44 = vsel %vm944_vm9, %v1026_v43, %v1025_v41 }
 0x382   : > { %v1030_v46 = vsel %vm943_vm10, %v2731_v28, %v1027_v44 }
 0x383   : > { %1800 = vcosq.f32 %v1030_v46 }
 0x384   : > { %1802 = vsinq.f32 %v1030_v46 }
 0x390   : > { %v1801_v51 = vpop.eup %1800 }
 0x391   : > { %v1803_v52 = vpop.eup %1802  ;;  %v1041_v53 = vxor.u32 2147483648, %v1801_v51 }
 0x392   : > { %v1038_v31 = vxor.u32 2147483648, %v1803_v52 }
 0x393   : > { %v1042_v54 = vsel %vm1040_vm11, %v1041_v53, %v1803_v52  ;;  %v1146_v55 = vsel %vm1144_vm12, %v1041_v53, %v1803_v52 }
 0x394   : > { %v1039_v57 = vsel %vm1037_vm13, %v1801_v51, %v1038_v31  ;;  %v1143_v14 = vsel %vm1141_vm14, %v1801_v51, %v1038_v31 }
 0x395   : > { %v1043_v58 = vsel %vm1036_vm15, %v1039_v57, %v1042_v54  ;;  %v1147_v59 = vsel %vm1140_vm0, %v1143_v14, %v1146_v55 }
 0x396   : > { %v1044_v60 = vsel %vm1034_vm2, nan, %v1043_v58  ;;  %v1148_v61 = vsel %vm1034_vm2, nan, %v1147_v59 }
 0x397   : > { %v1149_v62 = vsel %vm530_vm1, %v1044_v60, %v1148_v61 }
 0x398   : > { %1150 = vst [vmem:[%s2927_s24] sm:$0xff] %v1149_v62 }
 0x399 PF: > { %s2993_s9 = sld [smem:[#allocation27_spill]]  ;;  %s1192_s3 = sshll.u32 %s510_s12, 4  ;;  %s1193_s3 = int_to_ptr.vmem [resolvable:$true] %s1192_s3 }
 0x39a   : > { %s2994_s10 = sld [smem:[#allocation28_spill]]  ;;  %s1157_s23 = scalar_lea.sflag [#allocation14], %s2555_s1 }
 0x39b   : > { %s2995_s7 = sld [smem:[#allocation45_spill]]  ;;  %s1944_s8 = scalar_lea.vmem %s1193_s3, 128 }
 0x39c   : > { %p1945_p3 = scmp.ne.s32.totalorder %s1193_s3, %s1944_s8  ;;  %s2184_s6 = smov [#allocation13]  }
 0x39d   : > { %s1948_s4 = sshll.u32 %s2184_s6, 4  ;;  %s1949_s4 = int_to_ptr.vmem [resolvable:$false] %s1948_s4 }
 0x39e   : > { %p1946_p8 = pnand %p1945_p3, %p2519_p4  ;;  %p1951_p1 = scmp.lt.s32.totalorder %s1193_s3, %s1949_s4 }
 0x39f   : > { %s1497_s22 = sshll.u32 %s2993_s9, 1  ;;  %s1950_s9 = scalar_lea.vmem %s1949_s4, 256 }
 0x3a0   : > { %s2760_s2 = sadd.s32 %s2994_s10, %s1497_s22  ;;  %p1947_p13 = pneg %p1946_p8 }
 0x3a1   : > { %s1498_s19 = sshll.u32 %s2760_s2, 7  ;;  %p1952_p6 = scmp.lt.s32.totalorder %s1950_s9, %s1944_s8 }
 0x3a2   : > { %s1190_s30 = scalar_lea.hbm %s2995_s7, %s1498_s19 }
 0x3a3   : > { %p1953_p2 = por %p1952_p6, %p1951_p1 }
 0x3a5   : > { %p1954_p11 = pnand %p1953_p2, %p1947_p13 }
 0x3a7   : > { %1957 = shalt.err (!%p1954_p11)
}
 0x3a8   : > { %s1958_s12 = scalar_lea.hbm %s1190_s30, 128  ;;  %s1962_s11 = scalar_lea.hbm %s2995_s7, 768 }
 0x3a9   : > { %p1959_p9 = scmp.ne.s32.totalorder %s1190_s30, %s1958_s12  ;;  %p1963_p7 = scmp.lt.s32.totalorder %s1190_s30, %s2995_s7 }
 0x3aa   : > { %p1964_p12 = scmp.lt.s32.totalorder %s1962_s11, %s1958_s12 }
 0x3ab   : > { %p1960_p0 = pnand %p1959_p9, %p2519_p4 }
 0x3ac   : > { %p1965_p5 = por %p1964_p12, %p1963_p7 }
 0x3ad   : > { %p1961_p10 = pneg %p1960_p0 }
 0x3af   : > { %p1966_p3 = pnand %p1965_p5, %p1961_p10 }
 0x3b1   : > { %1969 = shalt.err (!%p1966_p3)
}
 0x3b2   : > { %1629 = dma.vmem_to_hbm [thread:$0]  (%p2519_p4), %s1193_s3, 128, %s1190_s30, %s1157_s23  }
 0x3b3   : > { %s2996_s4 = sld [smem:[#allocation44_spill]]  ;;  %s1177_s24 = sshll.u32 %s503_s13, 4  ;;  %s1178_s24 = int_to_ptr.vmem [resolvable:$true] %s1177_s24 }
 0x3b4   : > { %s1501_s9 = sshll.u32 %s2994_s10, 7  ;;  %s2997_s12 = sand.u32 1, %s2112_s28  }
 0x3b5   : > { %s1152_s22 = scalar_lea.sflag [#allocation5], %s2997_s12  ;;  %s1970_s26 = scalar_lea.vmem %s1178_s24, 128 }
 0x3b6   : > { %p1971_p8 = scmp.ne.s32.totalorder %s1178_s24, %s1970_s26  ;;  %s2185_s11 = smov [#allocation12]  }
 0x3b7   : > { %s1974_s0 = sshll.u32 %s2185_s11, 4  ;;  %s1975_s0 = int_to_ptr.vmem [resolvable:$false] %s1974_s0 }
 0x3b8   : > { %p1972_p13 = pnand %p1971_p8, %p2519_p4  ;;  %s1976_s2 = scalar_lea.vmem %s1975_s0, 256 }
 0x3b9   : > { %s2790_s15 = scalar_lea.hbm %s2996_s4, %s1498_s19  ;;  %p1977_p6 = scmp.lt.s32.totalorder %s1178_s24, %s1975_s0 }
 0x3ba   : > { %p1973_p1 = pneg %p1972_p13  ;;  %p1978_p2 = scmp.lt.s32.totalorder %s1976_s2, %s1970_s26 }
 0x3bc   : > { %p1979_p11 = por %p1978_p2, %p1977_p6 }
 0x3be   : > { %p1980_p9 = pnand %p1979_p11, %p1973_p1 }
 0x3c0   : > { %1983 = shalt.err (!%p1980_p9)
}
 0x3c1   : > { %s1984_s5 = scalar_lea.hbm %s2790_s15, 128  ;;  %s1988_s3 = scalar_lea.hbm %s2996_s4, 768 }
 0x3c2   : > { %p1985_p0 = scmp.ne.s32.totalorder %s2790_s15, %s1984_s5  ;;  %p1989_p12 = scmp.lt.s32.totalorder %s2790_s15, %s2996_s4 }
 0x3c3   : > { %p1990_p5 = scmp.lt.s32.totalorder %s1988_s3, %s1984_s5 }
 0x3c4   : > { %p1986_p10 = pnand %p1985_p0, %p2519_p4 }
 0x3c5   : > { %p1991_p3 = por %p1990_p5, %p1989_p12 }
 0x3c6   : > { %p1987_p7 = pneg %p1986_p10 }
 0x3c8   : > { %p1992_p8 = pnand %p1991_p3, %p1987_p7 }
 0x3ca   : > { %1995 = shalt.err (!%p1992_p8)
}
 0x3cb   : > { %s2998_s0 = sld [smem:[#allocation36_spill]]  ;;  %s3001_s2 = scalar_lea.vmem [#allocation15], %s2547_s21 }
 0x3cc   : > { %1628 = dma.vmem_to_hbm [thread:$0]  (%p2519_p4), %s1178_s24, 128, %s2790_s15, %s1152_s22  }
 0x3cd   : > { %s2999_s12 = sld [smem:[#allocation46_spill]]  ;;  %s1205_s13 = sshll.u32 %s3001_s2, 4  ;;  %s1206_s13 = int_to_ptr.vmem [resolvable:$true] %s1205_s13 }
 0x3ce   : > { %s1996_s10 = scalar_lea.vmem %s1206_s13, 128  ;;  %s2186_s5 = smov [#allocation15]  }
 0x3cf   : > { %p1997_p13 = scmp.ne.s32.totalorder %s1206_s13, %s1996_s10  ;;  %s2000_s3 = sshll.u32 %s2186_s5, 4  ;;  %s2001_s3 = int_to_ptr.vmem [resolvable:$false] %s2000_s3 }
 0x3d0   : > { %s2002_s20 = scalar_lea.vmem %s2001_s3, 256  ;;  %p2003_p11 = scmp.lt.s32.totalorder %s1206_s13, %s2001_s3 }
 0x3d1   : > { %p3002_p1 = scmp.ne.s32.totalorder %s2998_s0, 0  ;;  %p2004_p9 = scmp.lt.s32.totalorder %s2002_s20, %s1996_s10 }
 0x3d3   : > { %s3000_s26 = smov %s2999_s12  ;;  %s1203_s11 = scalar_lea.hbm %s2999_s12, %s1501_s9 }
 0x3d4   : > { %p1998_p6 = pnand %p1997_p13, %p3002_p1  ;;  %p2005_p0 = por %p2004_p9, %p2003_p11 }
 0x3d6   : > { %p1999_p2 = pneg %p1998_p6 }
 0x3d8   : > { %p2006_p4 = pnand %p2005_p0, %p1999_p2 }
 0x3da   : > { %2009 = shalt.err (!%p2006_p4)
}
 0x3db   : > { %s2010_s15 = scalar_lea.hbm %s1203_s11, 128  ;;  %s2014_s9 = scalar_lea.hbm %s3000_s26, 256 }
 0x3dc   : > { %p2011_p10 = scmp.ne.s32.totalorder %s1203_s11, %s2010_s15  ;;  %p2015_p5 = scmp.lt.s32.totalorder %s1203_s11, %s3000_s26 }
 0x3dd   : > { %p2016_p3 = scmp.lt.s32.totalorder %s2014_s9, %s2010_s15 }
 0x3de   : > { %p2012_p7 = pnand %p2011_p10, %p3002_p1 }
 0x3df   : > { %p2017_p8 = por %p2016_p3, %p2015_p5 }
 0x3e0   : > { %p2013_p12 = pneg %p2012_p7 }
 0x3e2   : > { %p2018_p13 = pnand %p2017_p8, %p2013_p12 }
 0x3e4   : > { %2021 = shalt.err (!%p2018_p13)
}
 0x3e5   : > { %1630 = dma.vmem_to_hbm [thread:$0]  (%p3002_p1), %s1206_s13, 128, %s1203_s11, %s1157_s23  }
 0x3e6 PF: > { %p1661_p6 = scmp.ge.s32.totalorder %s2160_s18, 2  ;;  %s1217_s30 = sand.u32 1, %s2108_s27  }
 0x3e7   : > { %p3003_p2 = scmp.ne.s32.totalorder %s2978_s25, 0  ;;  %s1218_s8 = scalar_lea.sflag [#allocation5], %s1217_s30 }
 0x3e9   : > { %p1651_p11 = pnand %p1661_p6, %p3003_p2 }
 0x3eb   : > { %p1652_p9 = pneg %p1651_p11 }
 0x3ed   : > { %2095 = dma.done.wait (%p1652_p9), %s1218_s8, 128  }
 0x3ee   : > { %2097 = vsyncadd (%p1652_p9), %s1218_s8, 4294967168  ;;  %s3004_s6 = sadd.s32 4294967294, %s2160_s18  }
 0x3ef   : > { %s1226_s12 = sand.u32 1, %s3004_s6  }
 0x3f0   : > { %s1227_s2 = scalar_lea.sflag [#allocation14], %s1226_s12 }
 0x3f1   : > { %2099 = dma.done.wait (%p1652_p9), %s1227_s2, 128  }
 0x3f2   : > { %2101 = vsyncadd (%p1652_p9), %s1227_s2, 4294967168  ;;  %s3005_s1 = sld [smem:[#allocation37_spill]] }
 0x3f8   : > { %p3006_p1 = scmp.ne.s32.totalorder %s3005_s1, 0 }
 0x3fa   : > { %p1657_p0 = pnand %p1661_p6, %p3006_p1 }
 0x3fc   : > { %p1658_p4 = pneg %p1657_p0 }
 0x3fe   : > { %2103 = dma.done.wait (%p1658_p4), %s1227_s2, 128  }
 0x3ff   : > { %2105 = vsyncadd (%p1658_p4), %s1227_s2, 4294967168  ;;  %s34_s18 = sadd.s32 1, %s2160_s18   ;;  %s3008_s30 = sld [smem:[#allocation23_spill]] }
 0x400   : > { %p2841_p10 = scmp.ge.s32.totalorder %s34_s18, 8   ;;  %s3009_s9 = sld [smem:[#allocation24_spill]] }
 0x401   : > { %s3010_s10 = sld [smem:[#allocation30_spill]]  ;;  %s3017_s27 = smov %s2112_s28 }
 0x402   : > { %s3011_s11 = sld [smem:[#allocation25_spill]]  ;;  %s3018_s28 = smov %s2116_s29 }
 0x403   : > { %s3012_s12 = sld [smem:[#allocation26_spill]]  ;;  %s3019_s29 = smov %s2501_s14 }
 0x404   : > { %s3013_s13 = sld [smem:[#allocation35_spill]]  ;;  %s3020_s14 = smov %s2152_s16 }
 0x405   : > { %s3014_s25 = sld [smem:[#allocation29_spill]]  ;;  %s3021_s15 = smov %s2156_s17 }
 0x406   : > { %s3015_s23 = sld [smem:[#allocation32_spill]] }
 0x408   :  { %33 = sbr.rel (!%p2841_p10) target bundleno = 26 (0x1a), region = 180 }
 0x40b   : > { %s3022_s16 = smov %s3014_s25 }
 0x40c   : > { %s3023_s17 = smov %s3015_s23 }
 0x40d   :  { %1241 = vsyncpa [#allocation4], 1 }
 0x40e   :  { %1243 = vsyncpa [#allocation4 + $0x1], 1 }
 0x40f   :  { %1244 = vsyncpa [#allocation7], 1 }
 0x410   :  { %1246 = vsyncpa [#allocation7 + $0x1], 1 }
 0x411   :  { %1247 = vsyncpa [#allocation10], 1 }
 0x412   :  { %1249 = vsyncpa [#allocation10 + $0x1], 1 }
 0x413   :  { %1250 = vsyncpa [#allocation5], 1 }
 0x414   :  { %1252 = vsyncpa [#allocation5 + $0x1], 1 }
 0x415   :  { %1253 = vsyncpa [#allocation14], 1 }
 0x416   :  { %1255 = vsyncpa [#allocation14 + $0x1], 1 }

</bundles_post_ra>
